<compile_context>
chip_gen: v6e
topology: v6e:2x2x1
jax: 0.10.0
libtpu: 0.0.40
codegen_flags: <defaults>
</compile_context>

<pallas_src>
import functools

import jax
import jax.numpy as jnp
from jax.experimental import pallas as pl
from jax.experimental.pallas import tpu as pltpu


def _dice_kernel(x_ref, t_ref, out_ref, inter_acc, t_acc, *, hv, th, mask_tail):
    s = pl.program_id(1)  # spatial-tile index (reduction axis)

    @pl.when(s == 0)
    def _init():
        inter_acc[...] = jnp.zeros_like(inter_acc)
        t_acc[...] = jnp.zeros_like(t_acc)

    x = x_ref[...].astype(jnp.float32)          # (NB, C, TH, W)
    t = t_ref[...].astype(jnp.float32)          # (NB, C, TH, W)

    # Numerically-stable softmax over channels (axis=1).  Channel is a leading
    # (non-tiled) block axis, so these reductions are plain VPU ops.
    m = jnp.max(x, axis=1, keepdims=True)       # (NB, 1, TH, W)
    e = jnp.exp(x - m)                          # (NB, C, TH, W)
    den = jnp.sum(e, axis=1)                    # (NB, TH, W)
    num = jnp.sum(e * t, axis=1)                # (NB, TH, W)
    inv_den = pl.reciprocal(den)                # one exact divide per column

    contrib = jnp.sum(num * inv_den, axis=0)    # (TH, W)  per-column intersection
    t_contrib = jnp.sum(jnp.sum(t, axis=1), axis=0)   # (TH, W)  per-column target sum

    if mask_tail:
        # Only the trailing partial H-tile has garbage rows; masking the
        # per-column contributions (not the full (C,TH,W) operands) suffices:
        # jnp.where does not propagate NaN/Inf from the unselected operand.
        row = jax.lax.broadcasted_iota(jnp.int32, contrib.shape, 0)
        valid = (s * th + row) < hv
        contrib = jnp.where(valid, contrib, 0.0)
        t_contrib = jnp.where(valid, t_contrib, 0.0)

    inter_acc[...] += contrib
    t_acc[...] += t_contrib

    @pl.when(s == pl.num_programs(1) - 1)
    def _finalize():
        inter = jnp.sum(inter_acc[...])
        tsum = jnp.sum(t_acc[...])
        sub = jax.lax.broadcasted_iota(jnp.int32, out_ref.shape, 1)
        out_ref[...] = jnp.where(sub == 0, inter,
                                 jnp.where(sub == 1, tsum, 0.0))


def dice_loss_pallas(inputs, targets, smooth=1.0):
    """inputs, targets: NCHW arrays of identical shape.  targets may be bf16 /
    int8 / bool (cast to f32 in-kernel).  Returns a scalar loss."""
    assert inputs.shape == targets.shape, (
        f"ground truth has differing shape ({targets.shape}) from input ({inputs.shape})"
    )
    N, C, H, W = inputs.shape

    # Spatial view.  W >= 128: stream the native NCHW layout (no relayout copy).
    # W < 128: lanes would be badly under-utilized and DMA runs tiny, so fall
    # back to a lane-dense reshaped view (one-time relayout copy is cheaper).
    if W >= 128:
        Hv, Wv = H, W
        x4, t4 = inputs, targets
    else:
        HW = H * W
        if HW % 128 == 0:
            Hv, Wv = HW // 128, 128
        else:
            # TODO(synk): tile the lane axis in multiples of 128 with lane
            # masking instead of taking the whole row for this rare shape.
            Hv, Wv = 1, HW
        x4 = inputs.reshape(N, C, Hv, Wv)
        t4 = targets.reshape(N, C, Hv, Wv)

    # ---- Tile sizing against a conservative VMEM budget ----------------------
    # Per spatial column (per batch row): double-buffered x and t blocks plus
    # ~5 f32 temporaries over the channel axis, plus 2 f32 accumulator cells.
    isx = jnp.dtype(inputs.dtype).itemsize
    ist = jnp.dtype(targets.dtype).itemsize
    bytes_per_col = C * (2 * (isx + ist) + 5 * 4) + 2 * 4
    vmem_budget = 40 * 1024 * 1024            # fits v7x's 64 MiB with headroom
    max_cols = max(vmem_budget // bytes_per_col, 8 * 128)

    th_cap = max(max_cols // Wv, 1)
    if th_cap >= Hv or Hv <= 8:
        TH = Hv                                # full-extent block: always legal
    else:
        TH = min(max((th_cap // 8) * 8, 8), max((Hv // 8) * 8, 8))
    S = pl.cdiv(Hv, TH)
    mask_tail = (Hv % TH) != 0

    # Fold several batch rows per grid step when the whole H fits in one tile
    # (amortizes the ~0.35 us per-step overhead for small C), but keep at least
    # two batch blocks when N >= 2 so the "parallel" axis can use both v7x TCs.
    NB = 1
    if TH == Hv and N > 1:
        leftover = max(int(max_cols // (Hv * Wv)), 1)
        nb_cap = max(1, min(leftover, N // 2))
        for d in range(nb_cap, 0, -1):
            if N % d == 0:
                NB = d
                break
    NBlocks = N // NB

    kernel = functools.partial(_dice_kernel, hv=Hv, th=TH, mask_tail=mask_tail)

    partials = pl.pallas_call(
        kernel,
        out_shape=jax.ShapeDtypeStruct((NBlocks, 8, 128), jnp.float32),
        grid_spec=pltpu.PrefetchScalarGridSpec(
            num_scalar_prefetch=0,
            grid=(NBlocks, S),
            in_specs=[
                pl.BlockSpec((NB, C, TH, Wv), lambda nb, s: (nb, 0, s, 0)),
                pl.BlockSpec((NB, C, TH, Wv), lambda nb, s: (nb, 0, s, 0)),
            ],
            out_specs=pl.BlockSpec((1, 8, 128), lambda nb, s: (nb, 0, 0)),
            scratch_shapes=[
                pltpu.VMEM((TH, Wv), jnp.float32),   # running per-column intersection
                pltpu.VMEM((TH, Wv), jnp.float32),   # running per-column target sum
            ],
        ),
        compiler_params=pltpu.CompilerParams(
            # Batch blocks are fully independent (own accumulator epoch, own
            # output block) -> shardable across v7x's two TensorCores; the
            # spatial axis carries the accumulator -> sequential.
            dimension_semantics=("parallel", "arbitrary"),
            vmem_limit_bytes=48 * 1024 * 1024,
        ),
    )(x4, t4)

    inter = jnp.sum(partials[:, 0, 0])
    t_sum = jnp.sum(partials[:, 1, 0])
    # softmax sums to 1 per spatial column -> its total is exactly N*H*W
    # (f32-exact up to ~16.7M columns; ~1e-7 relative beyond that).
    sm_sum = jnp.float32(N * H * W)
    dice = (2.0 * inter + smooth) / (sm_sum + t_sum + smooth)
    return 1.0 - dice


def dice_loss_ref(inputs, targets, smooth=1.0):
    """Pure-JAX reference mirroring the PyTorch forward (default flags)."""
    sm = jax.nn.softmax(inputs.astype(jnp.float32), axis=1).reshape(-1)
    t = targets.astype(jnp.float32).reshape(-1)
    intersection = jnp.sum(sm * t)
    dice = (2.0 * intersection + smooth) / (jnp.sum(sm) + jnp.sum(t) + smooth)
    return 1.0 - dice


if __name__ == "__main__":
    key = jax.random.PRNGKey(0)
    k1, k2 = jax.random.split(key)

    N, C, H, W = 2, 4, 16, 16
    inputs = jax.random.normal(k1, (N, C, H, W), dtype=jnp.float32)
    # Binary mask targets.  Passing them as bf16 halves their HBM stream and is
    # exact for {0, 1} values; the kernel accumulates in f32.
    targets_f32 = jax.random.bernoulli(k2, 0.5, (N, C, H, W)).astype(jnp.float32)
    targets = targets_f32.astype(jnp.bfloat16)

    loss = dice_loss_pallas(inputs, targets, smooth=1.0)
    loss = jax.block_until_ready(loss)

    ref = dice_loss_ref(inputs, targets_f32, smooth=1.0)
    assert jnp.allclose(loss, ref, rtol=1e-5, atol=1e-6), (loss, ref)

    print("KERNEL_OK")
</pallas_src>

<mosaic_0001>
module attributes {stable_mosaic.version = 11 : i64} {
  func.func @_dice_kernel(%arg0: i32, %arg1: i32, %arg2: memref<1x4x2x128xf32, #tpu.memory_space<vmem>>, %arg3: memref<1x4x2x128xbf16, #tpu.memory_space<vmem>>, %arg4: memref<1x8x128xf32, #tpu.memory_space<vmem>>, %arg5: memref<2x128xf32, #tpu.memory_space<vmem>>, %arg6: memref<2x128xf32, #tpu.memory_space<vmem>>) attributes {dimension_semantics = [#tpu.dimension_semantics<parallel>, #tpu.dimension_semantics<arbitrary>], iteration_bounds = array<i64: 2, 1>, scalar_prefetch = 0 : i64, scratch_operands = 2 : i64, tpu.core_type = #tpu.core_type<tc>, window_params = [{transform_indices = @transform_0, window_bounds = array<i64: 1, 4, 2, 128>}, {transform_indices = @transform_1, window_bounds = array<i64: 1, 4, 2, 128>}, {transform_indices = @transform_2, window_bounds = array<i64: 1, 8, 128>}]} {
    %c0_i32 = arith.constant 0 : i32
    %0 = arith.cmpi eq, %arg1, %c0_i32 : i32
    %1 = arith.extui %0 : i1 to i32
    %c0_i32_0 = arith.constant 0 : i32
    %2 = arith.cmpi ne, %1, %c0_i32_0 : i32
    scf.if %2 {
      %cst_23 = arith.constant 0.000000e+00 : f32
      %28 = vector.broadcast %cst_23 : f32 to vector<2x128xf32>
      %c0_24 = arith.constant 0 : index
      %c0_25 = arith.constant 0 : index
      %29 = vector.load %arg5[%c0_24, %c0_25] : memref<2x128xf32, #tpu.memory_space<vmem>>, vector<2x128xf32>
      tpu.vector_store %arg5[%c0_24, %c0_25], %28 {strides = array<i32>} : memref<2x128xf32, #tpu.memory_space<vmem>>, vector<2x128xf32>,
      %cst_26 = arith.constant 0.000000e+00 : f32
      %30 = vector.broadcast %cst_26 : f32 to vector<2x128xf32>
      %c0_27 = arith.constant 0 : index
      %c0_28 = arith.constant 0 : index
      %31 = vector.load %arg6[%c0_27, %c0_28] : memref<2x128xf32, #tpu.memory_space<vmem>>, vector<2x128xf32>
      tpu.vector_store %arg6[%c0_27, %c0_28], %30 {strides = array<i32>} : memref<2x128xf32, #tpu.memory_space<vmem>>, vector<2x128xf32>,
    } else {
    }
    %c0 = arith.constant 0 : index
    %c0_1 = arith.constant 0 : index
    %c0_2 = arith.constant 0 : index
    %c0_3 = arith.constant 0 : index
    %3 = vector.load %arg2[%c0, %c0_1, %c0_2, %c0_3] : memref<1x4x2x128xf32, #tpu.memory_space<vmem>>, vector<1x4x2x128xf32>
    %c0_4 = arith.constant 0 : index
    %c0_5 = arith.constant 0 : index
    %c0_6 = arith.constant 0 : index
    %c0_7 = arith.constant 0 : index
    %4 = vector.load %arg3[%c0_4, %c0_5, %c0_6, %c0_7] : memref<1x4x2x128xbf16, #tpu.memory_space<vmem>>, vector<1x4x2x128xbf16>
    %5 = arith.extf %4 : vector<1x4x2x128xbf16> to vector<1x4x2x128xf32>
    %cst = arith.constant dense<0xFF800000> : vector<1x2x128xf32>
    %6 = vector.multi_reduction <maximumf>, %3, %cst [1] : vector<1x4x2x128xf32> to vector<1x2x128xf32>
    %7 = vector.shape_cast %6 : vector<1x2x128xf32> to vector<1x1x2x128xf32>
    %8 = vector.broadcast %7 : vector<1x1x2x128xf32> to vector<1x4x2x128xf32>
    %9 = arith.subf %3, %8 : vector<1x4x2x128xf32>
    %10 = math.exp %9 : vector<1x4x2x128xf32>
    %cst_8 = arith.constant dense<0.000000e+00> : vector<1x2x128xf32>
    %11 = vector.multi_reduction <add>, %10, %cst_8 [1] : vector<1x4x2x128xf32> to vector<1x2x128xf32>
    %12 = arith.mulf %10, %5 : vector<1x4x2x128xf32>
    %cst_9 = arith.constant dense<0.000000e+00> : vector<1x2x128xf32>
    %13 = vector.multi_reduction <add>, %12, %cst_9 [1] : vector<1x4x2x128xf32> to vector<1x2x128xf32>
    %14 = tpu.reciprocal %11 : vector<1x2x128xf32> -> vector<1x2x128xf32>
    %15 = arith.mulf %13, %14 : vector<1x2x128xf32>
    %cst_10 = arith.constant dense<0.000000e+00> : vector<2x128xf32>
    %16 = vector.multi_reduction <add>, %15, %cst_10 [0] : vector<1x2x128xf32> to vector<2x128xf32>
    %cst_11 = arith.constant dense<0.000000e+00> : vector<1x2x128xf32>
    %17 = vector.multi_reduction <add>, %5, %cst_11 [1] : vector<1x4x2x128xf32> to vector<1x2x128xf32>
    %cst_12 = arith.constant dense<0.000000e+00> : vector<2x128xf32>
    %18 = vector.multi_reduction <add>, %17, %cst_12 [0] : vector<1x2x128xf32> to vector<2x128xf32>
    %c0_13 = arith.constant 0 : index
    %c0_14 = arith.constant 0 : index
    %19 = vector.load %arg5[%c0_13, %c0_14] : memref<2x128xf32, #tpu.memory_space<vmem>>, vector<2x128xf32>
    %20 = arith.addf %19, %16 : vector<2x128xf32>
    %c0_15 = arith.constant 0 : index
    %c0_16 = arith.constant 0 : index
    %21 = vector.load %arg5[%c0_15, %c0_16] : memref<2x128xf32, #tpu.memory_space<vmem>>, vector<2x128xf32>
    tpu.vector_store %arg5[%c0_15, %c0_16], %20 {strides = array<i32>} : memref<2x128xf32, #tpu.memory_space<vmem>>, vector<2x128xf32>,
    %c0_17 = arith.constant 0 : index
    %c0_18 = arith.constant 0 : index
    %22 = vector.load %arg6[%c0_17, %c0_18] : memref<2x128xf32, #tpu.memory_space<vmem>>, vector<2x128xf32>
    %23 = arith.addf %22, %18 : vector<2x128xf32>
    %c0_19 = arith.constant 0 : index
    %c0_20 = arith.constant 0 : index
    %24 = vector.load %arg6[%c0_19, %c0_20] : memref<2x128xf32, #tpu.memory_space<vmem>>, vector<2x128xf32>
    tpu.vector_store %arg6[%c0_19, %c0_20], %23 {strides = array<i32>} : memref<2x128xf32, #tpu.memory_space<vmem>>, vector<2x128xf32>,
    %c0_i32_21 = arith.constant 0 : i32
    %25 = arith.cmpi eq, %arg1, %c0_i32_21 : i32
    %26 = arith.extui %25 : i1 to i32
    %c0_i32_22 = arith.constant 0 : i32
    %27 = arith.cmpi ne, %26, %c0_i32_22 : i32
    scf.if %27 {
      %c0_23 = arith.constant 0 : index
      %c0_24 = arith.constant 0 : index
      %28 = vector.load %arg5[%c0_23, %c0_24] : memref<2x128xf32, #tpu.memory_space<vmem>>, vector<2x128xf32>
      %29 = vector.shape_cast %28 : vector<2x128xf32> to vector<1x2x128xf32>
      %cst_25 = arith.constant dense<0.000000e+00> : vector<1xf32>
      %30 = vector.multi_reduction <add>, %29, %cst_25 [1, 2] : vector<1x2x128xf32> to vector<1xf32>
      %31 = vector.shape_cast %30 : vector<1xf32> to vector<1x1x1xf32>
      %32 = vector.extract %31[0, 0, 0] : f32 from vector<1x1x1xf32>
      %c0_26 = arith.constant 0 : index
      %c0_27 = arith.constant 0 : index
      %33 = vector.load %arg6[%c0_26, %c0_27] : memref<2x128xf32, #tpu.memory_space<vmem>>, vector<2x128xf32>
      %34 = vector.shape_cast %33 : vector<2x128xf32> to vector<1x2x128xf32>
      %cst_28 = arith.constant dense<0.000000e+00> : vector<1xf32>
      %35 = vector.multi_reduction <add>, %34, %cst_28 [1, 2] : vector<1x2x128xf32> to vector<1xf32>
      %36 = vector.shape_cast %35 : vector<1xf32> to vector<1x1x1xf32>
      %37 = vector.extract %36[0, 0, 0] : f32 from vector<1x1x1xf32>
      %38 = tpu.iota {dimensions = array<i32: 1>} : vector<1x8x128xi32>
      %c0_i32_29 = arith.constant 0 : i32
      %39 = vector.broadcast %c0_i32_29 : i32 to vector<1x8x128xi32>
      %40 = arith.cmpi eq, %38, %39 : vector<1x8x128xi32>
      %c1_i32 = arith.constant 1 : i32
      %41 = vector.broadcast %c1_i32 : i32 to vector<1x8x128xi32>
      %42 = arith.cmpi eq, %38, %41 : vector<1x8x128xi32>
      %cst_30 = arith.constant 0.000000e+00 : f32
      %43 = vector.broadcast %37 : f32 to vector<1x8x128xf32>
      %44 = vector.broadcast %cst_30 : f32 to vector<1x8x128xf32>
      %45 = arith.select %42, %43, %44 : vector<1x8x128xi1>, vector<1x8x128xf32>
      %46 = vector.broadcast %32 : f32 to vector<1x8x128xf32>
      %47 = arith.select %40, %46, %45 : vector<1x8x128xi1>, vector<1x8x128xf32>
      %c0_31 = arith.constant 0 : index
      %c0_32 = arith.constant 0 : index
      %c0_33 = arith.constant 0 : index
      %48 = vector.load %arg4[%c0_31, %c0_32, %c0_33] : memref<1x8x128xf32, #tpu.memory_space<vmem>>, vector<1x8x128xf32>
      tpu.vector_store %arg4[%c0_31, %c0_32, %c0_33], %47 {strides = array<i32>} : memref<1x8x128xf32, #tpu.memory_space<vmem>>, vector<1x8x128xf32>,
    } else {
    }
    return
  }
  func.func @transform_0(%arg0: i32, %arg1: i32) -> (i32, i32, i32, i32) {
    %c0_i32 = arith.constant 0 : i32
    %c0_i32_0 = arith.constant 0 : i32
    %c0_i32_1 = arith.constant 0 : i32
    return %arg0, %c0_i32, %arg1, %c0_i32_0 : i32, i32, i32, i32
  }
  func.func @transform_1(%arg0: i32, %arg1: i32) -> (i32, i32, i32, i32) {
    %c0_i32 = arith.constant 0 : i32
    %c0_i32_0 = arith.constant 0 : i32
    %c0_i32_1 = arith.constant 0 : i32
    return %arg0, %c0_i32, %arg1, %c0_i32_0 : i32, i32, i32, i32
  }
  func.func @transform_2(%arg0: i32, %arg1: i32) -> (i32, i32, i32) {
    %c0_i32 = arith.constant 0 : i32
    %c0_i32_0 = arith.constant 0 : i32
    %c0_i32_1 = arith.constant 0 : i32
    return %arg0, %c0_i32, %c0_i32_0 : i32, i32, i32
  }
}

</mosaic_0001>

<bundles_post_ra>
// kernel: tpu_custom_call.1
= control target key start
LH: loop header
LB: loop body
LE: loop exit
PB: predicated region body
PF: predicated region fallthrough
CT: control target
= control target key end

     0   :  { %7 = vsyncpa [#allocation5], 0  ;;  %s907_s0 = inlined_call_operand.hbm [shape: f32[2,4,2,128], index: 0, kind: input, shape index: {}]   ;;  %s908_s1 = inlined_call_operand.hbm [shape: bf16[2,4,2,128], index: 1, kind: input, shape index: {}]   ;;  %s909_s2 = inlined_call_operand.hbm [shape: f32[2,8,128], index: 2, kind: output, shape index: {}]  }
   0x1   :  { %9 = vsyncpa [#allocation5 + $0x1], 0 }
   0x2   :  { %10 = vsyncpa [#allocation8], 0 }
   0x3   :  { %12 = vsyncpa [#allocation8 + $0x1], 0 }
   0x4   :  { %13 = vsyncpa [#allocation6], 0 }
   0x5   :  { %15 = vsyncpa [#allocation6 + $0x1], 0  ;;  %s717_s9 = smov 0   ;;  %s719_s10 = smov 0  }
   0x6   :  { %s721_s11 = smov 0   ;;  %s723_s12 = smov 0  }
   0x7   :  { %s725_s13 = smov 0   ;;  %s727_s14 = smov 0  }
   0x8 LB: > { %s446_s15 = sadd.s32 4294967295, %s692_s14   ;;  %s447_s16 = sadd.s32 4294967294, %s692_s14   ;;  %s692_s14 = sphi %s727_s14, %s21_s14   ;;  %s688_s13 = sphi %s725_s13, %s920_s13   ;;  %s684_s12 = sphi %s723_s12, %s919_s12   ;;  %s680_s11 = sphi %s721_s11, %s918_s11   ;;  %s676_s10 = sphi %s719_s10, %s917_s10   ;;  %s672_s9 = sphi %s717_s9, %s916_s9  }
   0x9   : > { %s33_s17 = sadd.s32 1, %s688_s13  ;;  %s42_s18 = sadd.s32 1, %s680_s11 }
   0xa   : > { %p35_p0 = scmp.ge.s32.totalorder %s33_s17, 2  ;;  %p49_p1 = scmp.ne.s32.totalorder %s680_s11, %s676_s10 }
   0xb   : > { %p50_p2 = scmp.eq.s32.totalorder %s692_s14, 0  ;;  %p55_p3 = scmp.ne.s32.totalorder %s676_s10, %s672_s9 }
   0xc   : > { %s922_s17 = smov (%p35_p0, %s33_s17), 0  ;;  %p56_p5 = scmp.eq.s32.totalorder %s446_s15, 0 }
   0xd   : > { %p758_p4 = por %p50_p2, %p49_p1  ;;  %s37_s20 = ssub.s32 %s688_s13, %s922_s17 }
   0xe   : > { %p107_p6 = scmp.eq.s32.totalorder %s446_s15, 1  ;;  %p40_p7 = scmp.eq.s32.totalorder %s37_s20, 0 }
   0xf   : > { %p764_p8 = por %p56_p5, %p55_p3  ;;  %p113_p10 = scmp.eq.s32.totalorder %s447_s16, 1 }
  0x10   : > { %p768_p9 = por %p107_p6, %p49_p1  ;;  %p449_p12 = scmp.ge.s32.totalorder %s692_s14, 2 }
  0x11   : > { %s773_s23 = scalar_select %p40_p7, %s680_s11, %s42_s18  }
  0x12   : > { %p775_p11 = por %p113_p10, %p55_p3  ;;  %p487_p13 = scmp.lt.s32.totalorder %s692_s14, 2 }
  0x13   : > { %s782_s25 = sand.u32 1, %s680_s11   ;;  %s464_s27 = sshll.u32 %s688_s13, 7 }
  0x14   : > { %s450_s26 = sshll.u32 %s782_s25, 3  ;;  %s144_s30 = scalar_lea.hbm %s907_s0, %s464_s27 }
  0x15   : > { %s137_s3 = scalar_lea.vmem [#allocation4], %s450_s26  ;;  %p791_p0 = pnand %p487_p13, %p758_p4 }
  0x16   : > { %s145_s4 = sshll.u32 %s137_s3, 4  ;;  %p456_p1 = scmp.ge.s32.totalorder %s692_s14, 1  ;;  %s146_s4 = int_to_ptr.vmem [resolvable:$true] %s145_s4 }
  0x17   : > { %s134_s6 = scalar_lea.sflag [#allocation5], %s782_s25  ;;  %p554_p2 = pneg %p791_p0 }
  0x18   : > { %s565_s7 = scalar_lea.vmem %s146_s4, 128  ;;  %s694_s8 = smov [#allocation4]  }
  0x19   : > { %p566_p3 = scmp.ne.s32.totalorder %s146_s4, %s565_s7  ;;  %s570_s15 = sshll.u32 %s694_s8, 4  ;;  %s571_s15 = int_to_ptr.vmem [resolvable:$false] %s570_s15 }
  0x1a   : > { %s572_s16 = scalar_lea.vmem %s571_s15, 256  ;;  %p573_p4 = scmp.lt.s32.totalorder %s146_s4, %s571_s15 }
  0x1b   : > { %p568_p5 = pnand %p566_p3, %p554_p2  ;;  %p574_p7 = scmp.lt.s32.totalorder %s572_s16, %s565_s7 }
  0x1d   : > { %p569_p6 = pneg %p568_p5  ;;  %p575_p10 = por %p574_p7, %p573_p4 }
  0x1f   : > { %p576_p13 = pnand %p575_p10, %p569_p6 }
  0x21   : > { %579 = shalt.err (!%p576_p13)
}
  0x22   : > { %s695_s18 = smov 32   ;;  %s696_s19 = smov 2  }
  0x23   : > { %479 = dma.hbm_to_vmem [thread:$0]  (!%p791_p0), %s144_s30, 128, %s146_s4, %s134_s6, %s695_s18, %s695_s18, %s696_s19  }
  0x24   : > { %p175_p3 = scmp.lt.s32.totalorder %s692_s14, 3  ;;  %s453_s20 = sshll.u32 %s782_s25, 2 }
  0x25   : > { %s465_s26 = sshll.u32 %s688_s13, 6  ;;  %s159_s7 = scalar_lea.vmem [#allocation7], %s453_s20 }
  0x26   : > { %p809_p5 = pnand %p456_p1, %p175_p3  ;;  %s166_s3 = scalar_lea.hbm %s908_s1, %s465_s26 }
  0x27   : > { %s167_s8 = sshll.u32 %s159_s7, 4  ;;  %s156_s15 = scalar_lea.sflag [#allocation8], %s782_s25  ;;  %s168_s8 = int_to_ptr.vmem [resolvable:$true] %s167_s8 }
  0x28   : > { %s593_s16 = scalar_lea.vmem %s168_s8, 64  ;;  %s697_s30 = smov [#allocation7]  }
  0x29   : > { %p594_p6 = scmp.ne.s32.totalorder %s168_s8, %s593_s16  ;;  %s598_s4 = sshll.u32 %s697_s30, 4  ;;  %s599_s4 = int_to_ptr.vmem [resolvable:$false] %s598_s4 }
  0x2a   : > { %s600_s6 = scalar_lea.vmem %s599_s4, 128  ;;  %p601_p1 = scmp.lt.s32.totalorder %s168_s8, %s599_s4 }
  0x2b   : > { %p596_p4 = pnand %p594_p6, %p554_p2  ;;  %p602_p10 = scmp.lt.s32.totalorder %s600_s6, %s593_s16 }
  0x2d   : > { %p597_p7 = pneg %p596_p4  ;;  %p603_p13 = por %p602_p10, %p601_p1 }
  0x2f   : > { %p604_p3 = pnand %p603_p13, %p597_p7 }
  0x31   : > { %607 = shalt.err (!%p604_p3)
}
  0x32   : > { %s698_s18 = smov 16   ;;  %s699_s19 = smov 1  }
  0x33   : > { %482 = dma.hbm_to_vmem [thread:$0]  (!%p791_p0), %s166_s3, 64, %s168_s8, %s156_s15, %s698_s18, %s698_s18, %s699_s19  }
  0x34   : > { %179 = sbr.rel (%p809_p5) target bundleno = 344 (0x158), region = 28  ;;  %s825_s25 = sand.u32 (!%p809_p5), 1, %s676_s10  }
  0x35   : > { %s457_s20 = sshll.u32 (!%p809_p5), %s825_s25, 3  ;;  %s182_s26 = scalar_lea.sflag (!%p809_p5), [#allocation5], %s825_s25 }
  0x36   : > { %s185_s28 = scalar_lea.vmem (!%p809_p5), [#allocation4], %s457_s20 }
  0x39   : > { %659 = dma.done.wait (%p764_p8), %s182_s26, 128  }
  0x3a   : > { %661 = vsyncadd (%p764_p8), %s182_s26, 4294967168  ;;  %s458_s5 = sshll.u32 %s825_s25, 2  ;;  %s191_s27 = scalar_lea.sflag [#allocation8], %s825_s25 }
  0x3b   : > { %s194_s29 = scalar_lea.vmem [#allocation7], %s458_s5 }
  0x3c   : > { %663 = dma.done.wait (%p764_p8), %s191_s27, 64  }
  0x3d   : > { %665 = vsyncadd (%p764_p8), %s191_s27, 4294967232  ;;  %v700_v0 = vmov 0.0   ;;  %vm238_vm0 = vcmask 1041408   ;;  %v226_v1 = vld [vmem:[%s185_s28] sm:$0x3]  ;;  %s461_s21 = sshll.u32 %s684_s12, 7 }
  0x3e   : > { %224 = vst [vmem:[#allocation2] sm:$0x3] %v700_v0  ;;  %225 = vst [vmem:[#allocation3] sm:$0x3] %v700_v0  ;;  %v227_v2 = vld [vmem:[%s185_s28 + $0x2] sm:$0x3]  ;;  %s865_s4 = scalar_lea.hbm %s909_s2, %s461_s21 }
  0x3f   : > { %v228_v3 = vld [vmem:[%s185_s28 + $0x4] sm:$0x3]  ;;  %v229_v4 = vld [vmem:[%s185_s28 + $0x6] sm:$0x3]  ;;  %v230_v5 = vld [vmem:[%s194_s29] sm:$0x1] }
  0x40   : > { %v231_v6 = vld [vmem:[%s194_s29 + $0x1] sm:$0x1]  ;;  %v232_v7 = vld [vmem:[%s194_s29 + $0x2] sm:$0x1]  ;;  %v233_v8 = vld [vmem:[%s194_s29 + $0x3] sm:$0x1]  ;;  %v234_v9 = vunpack.c.l.bf16 %v230_v5 }
  0x41   : > { %v235_v10 = vunpack.c.l.bf16 %v231_v6  ;;  %v239_v11 = vsel %vm238_vm0, %v226_v1, -inf  ;;  %v240_v12 = vsel %vm238_vm0, %v227_v2, -inf  ;;  %v236_v13 = vunpack.c.l.bf16 %v232_v7  ;;  %s219_s7 = scalar_lea.vmem [#allocation9], %s457_s20  ;;  %s328_s12 = scalar_lea.sflag [#allocation6], %s825_s25 }
  0x42   : > { %v237_v14 = vunpack.c.l.bf16 %v233_v8  ;;  %v241_v15 = vsel %vm238_vm0, %v228_v3, -inf  ;;  %v242_v16 = vsel %vm238_vm0, %v229_v4, -inf  ;;  %v243_v17 = vmax.f32 %v239_v11, %v240_v12  ;;  %s341_s8 = sshll.u32 %s219_s7, 4  ;;  %s701_s18 = smov [#allocation9]   ;;  %s342_s8 = int_to_ptr.vmem [resolvable:$true] %s341_s8 }
  0x43   : > { %v244_v18 = vmax.f32 %v241_v15, %v242_v16  ;;  %v279_v19 = vsel %vm238_vm0, %v234_v9, 0.0  ;;  %v280_v20 = vsel %vm238_vm0, %v235_v10, 0.0  ;;  %v282_v22 = vsel %vm238_vm0, %v236_v13, 0.0  ;;  %s608_s6 = scalar_lea.vmem %s342_s8, 128  ;;  %s612_s19 = sshll.u32 %s701_s18, 4  ;;  %s613_s19 = int_to_ptr.vmem [resolvable:$false] %s612_s19 }
  0x44   : > { %v281_v21 = vadd.f32 %v280_v20, %v279_v19  ;;  %v284_v24 = vsel %vm238_vm0, %v237_v14, 0.0  ;;  %p609_p8 = scmp.ne.s32.totalorder %s342_s8, %s608_s6  ;;  %s614_s20 = scalar_lea.vmem %s613_s19, 256 }
  0x45   : > { %v245_v23 = vmax.f32 %v243_v17, %v244_v18  ;;  %v290_v30 = vld [vmem:[#allocation3] sm:$0x3]  ;;  %v287_v60 = vld [vmem:[#allocation2] sm:$0x3]  ;;  %v318_v17 = vlaneseq  ;;  %p615_p5 = scmp.lt.s32.totalorder %s342_s8, %s613_s19  ;;  %p616_p6 = scmp.lt.s32.totalorder %s614_s20, %s608_s6 }
  0x46   : > { %v283_v25 = vadd.f32 %v282_v22, %v281_v21  ;;  %p610_p0 = pnand %p609_p8, %p768_p9 }
  0x47   : > { %v246_v26 = vsub.f32 %v226_v1, %v245_v23  ;;  %v247_v27 = vsub.f32 %v227_v2, %v245_v23  ;;  %v248_v28 = vsub.f32 %v228_v3, %v245_v23  ;;  %v249_v29 = vsub.f32 %v229_v4, %v245_v23  ;;  %p617_p4 = por %p616_p6, %p615_p5 }
  0x48   : > { %v285_v31 = vadd.f32 %v284_v24, %v283_v25  ;;  %v319_v18 = vshrl.u32 %v318_v17, 7  ;;  %p611_p2 = pneg %p610_p0 }
  0x49   : > { %v250_v32 = vmul.f32 1.442695, %v246_v26  ;;  %v252_v33 = vmul.f32 1.442695, %v247_v27  ;;  %v254_v34 = vmul.f32 1.442695, %v248_v28 }
  0x4a   : > { %v256_v35 = vmul.f32 1.442695, %v249_v29  ;;  %v291_v36 = vadd.f32 %v290_v30, %v285_v31  ;;  %vm321_vm1 = vcmp.eq.s32.totalorder %v319_v18, 1  ;;  %vm320_vm2 = vcmp.eq.s32.totalorder %v319_v18, 0  ;;  %p618_p7 = pnand %p617_p4, %p611_p2 }
  0x4b   : > { %542 = vpow2.f32 %v250_v32 }
  0x4c   : > { %544 = vpow2.f32 %v252_v33  ;;  %292 = vst [vmem:[#allocation3] sm:$0x3] %v291_v36 }
  0x4d   : > { %546 = vpow2.f32 %v254_v34 }
  0x4e   : > { %548 = vpow2.f32 %v256_v35 }
  0x53   : > { %v307_v0 = vld [vmem:[#allocation3] sm:$0x3] }
  0x54   : > { %v308_v2 = vsel %vm238_vm0, %v307_v0, 0.0 }
  0x58   : > { %v543_v37 = vpop.eup %542 }
  0x59   : > { %v545_v38 = vpop.eup %544  ;;  %v258_v39 = vsel %vm238_vm0, %v543_v37, 0.0  ;;  %v265_v46 = vmul.f32 %v543_v37, %v234_v9 }
  0x5a   : > { %v547_v40 = vpop.eup %546  ;;  %v259_v41 = vsel %vm238_vm0, %v545_v38, 0.0  ;;  %v266_v47 = vmul.f32 %v545_v38, %v235_v10 }
  0x5b   : > { %v549_v42 = vpop.eup %548  ;;  %v260_v43 = vadd.f32 %v259_v41, %v258_v39  ;;  %v261_v44 = vsel %vm238_vm0, %v547_v40, 0.0  ;;  %v267_v50 = vmul.f32 %v547_v40, %v236_v13  ;;  %v269_v51 = vsel %vm238_vm0, %v265_v46, 0.0 }
  0x5c   : > { %v263_v45 = vsel %vm238_vm0, %v549_v42, 0.0  ;;  %v270_v52 = vsel %vm238_vm0, %v266_v47, 0.0  ;;  %v268_v54 = vmul.f32 %v549_v42, %v237_v14 }
  0x5d   : > { %v262_v48 = vadd.f32 %v261_v44, %v260_v43  ;;  %v271_v53 = vadd.f32 %v270_v52, %v269_v51  ;;  %v272_v55 = vsel %vm238_vm0, %v267_v50, 0.0 }
  0x5e   : > { %v274_v57 = vsel %vm238_vm0, %v268_v54, 0.0 }
  0x5f   : > { %v264_v49 = vadd.f32 %v263_v45, %v262_v48  ;;  %v273_v56 = vadd.f32 %v272_v55, %v271_v53 }
  0x61   : > { %550 = vrcp.f32 %v264_v49  ;;  %v275_v58 = vadd.f32 %v274_v57, %v273_v56 }
  0x6e   : > { %v551_v59 = vpop.eup %550 }
  0x6f   : > { %v277_v61 = vmul.f32 %v551_v59, %v275_v58 }
  0x71   : > { %v288_v62 = vadd.f32 %v287_v60, %v277_v61 }
  0x73   : > { %289 = vst [vmem:[#allocation2] sm:$0x3] %v288_v62 }
  0x7a   : > { %v296_v63 = vld [vmem:[#allocation2] sm:$0x3] }
  0x7b   : > { %v297_v1 = vsel %vm238_vm0, %v296_v63, 0.0 }
  0x7c   : > { %298 = vadd.xlane.f32.xlu0 %v297_v1 }
  0x80   : > { %309 = vadd.xlane.f32.xlu0 %v308_v2 }
 0x105   : > { %v299_v3 = vpop.xlane.xlu0 %298 }
 0x106   : > { %v300_v4 = vrot.slane %v299_v3, 4 }
 0x108   : > { %v301_v5 = vadd.f32 %v300_v4, %v299_v3 }
 0x109   : > { %v310_v6 = vpop.xlane.xlu0 %309 }
 0x10a   : > { %v302_v7 = vrot.slane %v301_v5, 2  ;;  %v311_v8 = vrot.slane %v310_v6, 4 }
 0x10c   : > { %v312_v9 = vadd.f32 %v311_v8, %v310_v6  ;;  %v303_v10 = vadd.f32 %v302_v7, %v301_v5 }
 0x10e   : > { %v313_v11 = vrot.slane %v312_v9, 2  ;;  %v304_v12 = vrot.slane %v303_v10, 1 }
 0x110   : > { %v314_v13 = vadd.f32 %v313_v11, %v312_v9  ;;  %v305_v14 = vadd.f32 %v304_v12, %v303_v10 }
 0x112   : > { %466 = vpush %v305_v14  ;;  %v315_v15 = vrot.slane %v314_v13, 1 }
 0x114   : > { %v316_v16 = vadd.f32 %v315_v15, %v314_v13 }
 0x116   : > { %468 = vpush %v316_v16 }
 0x143   : > { %s467_s3 = spop %466 }
 0x144   : > { %v324_v20 = vstv %s467_s3 }
 0x147   : > { %s469_s15 = spop %468 }
 0x148   : > { %v322_v19 = vstv %s469_s15 }
 0x149   : > { %v323_v21 = vsel %vm321_vm1, %v322_v19, 0.0 }
 0x14a   : > { %v325_v22 = vsel %vm320_vm2, %v324_v20, %v323_v21 }
 0x14b   : > { %326 = vst [vmem:[%s219_s7] sm:$0xff] %v325_v22 }
 0x14c   : > { %621 = shalt.err (!%p618_p7)
}
 0x14d   : > { %s622_s26 = scalar_lea.hbm %s865_s4, 128  ;;  %s626_s5 = scalar_lea.hbm %s909_s2, 256 }
 0x14e   : > { %p623_p1 = scmp.ne.s32.totalorder %s865_s4, %s622_s26  ;;  %p627_p3 = scmp.lt.s32.totalorder %s865_s4, %s909_s2 }
 0x14f   : > { %p628_p8 = scmp.lt.s32.totalorder %s626_s5, %s622_s26 }
 0x150   : > { %p624_p10 = pnand %p623_p1, %p768_p9 }
 0x151   : > { %p629_p0 = por %p628_p8, %p627_p3 }
 0x152   : > { %p625_p13 = pneg %p624_p10 }
 0x154   : > { %p630_p2 = pnand %p629_p0, %p625_p13 }
 0x156   : > { %633 = shalt.err (!%p630_p2)
}
 0x157   : > { %474 = dma.vmem_to_hbm [thread:$0]  (%p768_p9), %s342_s8, 128, %s865_s4, %s328_s12  }
 0x158 PF: > { %s353_s21 = sand.u32 1, %s672_s9   ;;  %p484_p5 = pnand %p449_p12, %p775_p11 }
 0x159   : > { %s354_s3 = scalar_lea.sflag [#allocation6], %s353_s21 }
 0x15a   : > { %p485_p6 = pneg %p484_p5 }
 0x15c   : > { %667 = dma.done.wait (%p485_p6), %s354_s3, 128  }
 0x15d   : > { %669 = vsyncadd (%p485_p6), %s354_s3, 4294967168  ;;  %s21_s14 = sadd.s32 1, %s692_s14   ;;  %s916_s9 = smov %s676_s10 }
 0x15e   : > { %p18_p4 = scmp.ge.s32.totalorder %s21_s14, 4   ;;  %s917_s10 = smov %s680_s11 }
 0x15f   : > { %s918_s11 = smov %s773_s23  ;;  %s919_s12 = smov %s688_s13 }
 0x160   : > { %s920_s13 = smov %s922_s17  ;;  %20 = sbr.rel (!%p18_p4) target bundleno = 8 (0x8), region = 94 }
 0x165   :  { %359 = vsyncpa [#allocation5], 1 }
 0x166   :  { %361 = vsyncpa [#allocation5 + $0x1], 1 }
 0x167   :  { %362 = vsyncpa [#allocation8], 1 }
 0x168   :  { %364 = vsyncpa [#allocation8 + $0x1], 1 }
 0x169   :  { %365 = vsyncpa [#allocation6], 1 }
 0x16a   :  { %367 = vsyncpa [#allocation6 + $0x1], 1 }

</bundles_post_ra>
